<compile_context>
chip_gen: v7x
topology: tpu7x:2x2x1
jax: 0.10.0
libtpu: 0.0.40
codegen_flags: <defaults>
</compile_context>

<pallas_src>
import functools

import jax
import jax.numpy as jnp
from jax import lax
from jax.experimental import pallas as pl
from jax.experimental.pallas import tpu as pltpu


def _fast_recip(x):
    # EUP approximate reciprocal + one Newton-Raphson step -> ~f32 accuracy
    # without the VALU divide loop.
    r = pl.reciprocal(x, approx=True)
    return r * (2.0 - x * r)


def _dkd_kernel(tgt_ref, l1_ref, l2_ref, out_ref, *, alpha, beta, inv_temp):
    l1 = l1_ref[...].astype(jnp.float32) * inv_temp          # (TB, C)
    l2 = l2_ref[...].astype(jnp.float32) * inv_temp          # (TB, C)
    tgt = tgt_ref[...]                                        # (TB, 1) int32
    TB, C = l1.shape

    # one-hot ground-truth mask (== torch scatter_ on dim 1)
    col = lax.broadcasted_iota(jnp.int32, (TB, C), 1)
    gt = (col == tgt).astype(jnp.float32)
    other = 1.0 - gt

    # ---- single softmax pass shared by TCKD and NCKD ---------------------
    m1 = jnp.max(l1, axis=1, keepdims=True)
    m2 = jnp.max(l2, axis=1, keepdims=True)
    s1 = l1 - m1
    s2 = l2 - m2
    e1 = jnp.exp(s1)
    e2 = jnp.exp(s2)
    z1 = jnp.sum(e1, axis=1, keepdims=True)
    z2 = jnp.sum(e2, axis=1, keepdims=True)
    e1o = e1 * other
    e2o = e2 * other
    z1o = jnp.sum(e1o, axis=1, keepdims=True)   # masked sum (NOT z1 - e1_gt)
    z2o = jnp.sum(e2o, axis=1, keepdims=True)

    # ---- TCKD: binary (gt-class vs rest) KL ------------------------------
    p1_t = jnp.sum(e1 * gt, axis=1, keepdims=True) * _fast_recip(z1)
    p2_t = jnp.sum(e2 * gt, axis=1, keepdims=True) * _fast_recip(z2)
    p1_o = jnp.maximum(1.0 - p1_t, 0.0)
    p2_o = jnp.maximum(1.0 - p2_t, 0.0)

    tiny = 1e-30

    def kl_terms(p, q):
        # F.kl_div semantics: p * (log p - log q), term zeroed where p == 0.
        val = p * (jnp.log(jnp.maximum(p, tiny)) - jnp.log(q))
        return jnp.where(p > 0.0, val, 0.0)

    tckd = jnp.sum(kl_terms(p2_t, p1_t) + kl_terms(p2_o, p1_o))

    # ---- NCKD: KL over non-gt classes, fused (no re-softmax) -------------
    #   softmax(l2 - 1000*gt)      == e2 * other / z2o
    #   log_softmax(l1 - 1000*gt)  == s1 - log(z1o)   (on non-gt lanes)
    p2m = e2o * _fast_recip(z2o)                        # exactly 0 on gt lanes
    bracket = (s2 - jnp.log(z2o)) - (s1 - jnp.log(z1o))
    nckd = jnp.sum(p2m * bracket)                       # p2m == 0 -> term == 0

    partial = alpha * tckd + beta * nckd
    # lane-dense, fully-written output block (unmasked vst)
    out_ref[...] = jnp.full(out_ref.shape, partial, jnp.float32)


def _round_up(x, m):
    return ((x + m - 1) // m) * m


def decouple_ml_loss(logits1, logits2, target, *, alpha, beta, temperature,
                     block_b=512):
    B, C = logits1.shape
    assert logits2.shape == (B, C)

    # --- choose batch tile: multiple of 8 rows, sized for VMEM ------------
    itemsize = max(jnp.dtype(logits1.dtype).itemsize,
                   jnp.dtype(logits2.dtype).itemsize)
    budget = 20 * 1024 * 1024                       # safe on 64 MiB (v7x) VMEM
    per_row = 2 * 2 * C * itemsize + 10 * C * 4     # pipelined blocks + temps
    tb = min(block_b, max(8, budget // per_row))
    tb = max(8, (tb // 8) * 8)
    tb = min(tb, _round_up(B, 8))
    b_pad = _round_up(B, tb)
    num_tiles = b_pad // tb

    tgt2d = target.reshape(B, 1).astype(jnp.int32)
    if b_pad != B:
        # Zero-padded rows have logits1 == logits2 == 0, so both KL terms are
        # exactly 0 and the padding does not change the summed loss.
        padb = b_pad - B
        logits1 = jnp.pad(logits1, ((0, padb), (0, 0)))
        logits2 = jnp.pad(logits2, ((0, padb), (0, 0)))
        tgt2d = jnp.pad(tgt2d, ((0, padb), (0, 0)))

    kernel = functools.partial(
        _dkd_kernel,
        alpha=float(alpha),
        beta=float(beta),
        inv_temp=1.0 / float(temperature),
    )

    # NOTE: logits are streamed in their native dtype (no wrapper f32 cast).
    partials = pl.pallas_call(
        kernel,
        out_shape=jax.ShapeDtypeStruct((num_tiles, 8, 128), jnp.float32),
        grid=(num_tiles,),
        in_specs=[
            pl.BlockSpec((tb, 1), lambda i: (i, 0)),
            pl.BlockSpec((tb, C), lambda i: (i, 0)),
            pl.BlockSpec((tb, C), lambda i: (i, 0)),
        ],
        out_specs=pl.BlockSpec((1, 8, 128), lambda i: (i, 0, 0)),
        compiler_params=pltpu.CompilerParams(
            dimension_semantics=("parallel",),
            vmem_limit_bytes=48 * 1024 * 1024,
        ),
    )(tgt2d, logits1, logits2)

    T = float(temperature)
    return jnp.sum(partials[:, 0, 0]) * (T * T) / B


def _reference(logits1, logits2, target, alpha, beta, T):
    # Pure-JAX reference reproducing the PyTorch module exactly.
    B, C = logits1.shape
    gt = jax.nn.one_hot(target, C, dtype=jnp.float32)
    other = 1.0 - gt
    l1 = logits1.astype(jnp.float32)
    l2 = logits2.astype(jnp.float32)
    p1 = jax.nn.softmax(l1 / T, axis=1)
    p2 = jax.nn.softmax(l2 / T, axis=1)
    cat1 = jnp.concatenate([jnp.sum(p1 * gt, 1, keepdims=True),
                            jnp.sum(p1 * other, 1, keepdims=True)], axis=1)
    cat2 = jnp.concatenate([jnp.sum(p2 * gt, 1, keepdims=True),
                            jnp.sum(p2 * other, 1, keepdims=True)], axis=1)
    kl = lambda p, logq: jnp.where(p > 0, p * (jnp.log(p) - logq), 0.0)
    tckd = jnp.sum(kl(cat2, jnp.log(cat1))) / B * T * T
    p2b = jax.nn.softmax(l2 / T - 1000.0 * gt, axis=1)
    logp1b = jax.nn.log_softmax(l1 / T - 1000.0 * gt, axis=1)
    nckd = jnp.sum(kl(p2b, logp1b)) / B * T * T
    return alpha * tckd + beta * nckd


if __name__ == "__main__":
    alpha, beta, temperature = 1.0, 8.0, 4.0
    key = jax.random.PRNGKey(0)

    # (B, C): one divisible case, one that exercises padding / odd C.
    for (B, C) in [(8, 32), (20, 160)]:
        key, k1, k2, k3 = jax.random.split(key, 4)
        logits1 = jax.random.normal(k1, (B, C), dtype=jnp.float32) * 2.0
        logits2 = jax.random.normal(k2, (B, C), dtype=jnp.float32) * 2.0
        target = jax.random.randint(k3, (B,), 0, C, dtype=jnp.int32)

        loss = decouple_ml_loss(
            logits1, logits2, target,
            alpha=alpha, beta=beta, temperature=temperature)
        loss = jax.block_until_ready(loss)

        ref = _reference(logits1, logits2, target, alpha, beta, temperature)
        assert jnp.allclose(loss, ref, rtol=1e-3, atol=1e-5), (B, C, loss, ref)

    print("KERNEL_OK")
</pallas_src>

<mosaic_0001>
module attributes {stable_mosaic.version = 11 : i64} {
  func.func @_dkd_kernel(%arg0: i32, %arg1: memref<8x1xi32, #tpu.memory_space<vmem>>, %arg2: memref<8x32xf32, #tpu.memory_space<vmem>>, %arg3: memref<8x32xf32, #tpu.memory_space<vmem>>, %arg4: memref<1x8x128xf32, #tpu.memory_space<vmem>>) attributes {dimension_semantics = [#tpu.dimension_semantics<parallel>], iteration_bounds = array<i64: 1>, scalar_prefetch = 0 : i64, scratch_operands = 0 : i64, tpu.core_type = #tpu.core_type<tc>, window_params = [{transform_indices = @transform_0, window_bounds = array<i64: 8, 1>}, {transform_indices = @transform_1, window_bounds = array<i64: 8, 32>}, {transform_indices = @transform_2, window_bounds = array<i64: 8, 32>}, {transform_indices = @transform_3, window_bounds = array<i64: 1, 8, 128>}]} {
    %c0 = arith.constant 0 : index
    %c0_0 = arith.constant 0 : index
    %0 = vector.load %arg2[%c0, %c0_0] : memref<8x32xf32, #tpu.memory_space<vmem>>, vector<8x32xf32>
    %cst = arith.constant 2.500000e-01 : f32
    %1 = vector.broadcast %cst : f32 to vector<8x32xf32>
    %2 = arith.mulf %0, %1 : vector<8x32xf32>
    %c0_1 = arith.constant 0 : index
    %c0_2 = arith.constant 0 : index
    %3 = vector.load %arg3[%c0_1, %c0_2] : memref<8x32xf32, #tpu.memory_space<vmem>>, vector<8x32xf32>
    %cst_3 = arith.constant 2.500000e-01 : f32
    %4 = vector.broadcast %cst_3 : f32 to vector<8x32xf32>
    %5 = arith.mulf %3, %4 : vector<8x32xf32>
    %c0_4 = arith.constant 0 : index
    %c0_5 = arith.constant 0 : index
    %6 = vector.load %arg1[%c0_4, %c0_5] : memref<8x1xi32, #tpu.memory_space<vmem>>, vector<8x1xi32>
    %7 = tpu.iota {dimensions = array<i32: 1>} : vector<8x32xi32>
    %8 = vector.broadcast %6 : vector<8x1xi32> to vector<8x32xi32>
    %9 = arith.cmpi eq, %7, %8 : vector<8x32xi32>
    %10 = arith.extui %9 : vector<8x32xi1> to vector<8x32xi32>
    %11 = arith.sitofp %10 : vector<8x32xi32> to vector<8x32xf32>
    %cst_6 = arith.constant 1.000000e+00 : f32
    %12 = vector.broadcast %cst_6 : f32 to vector<8x32xf32>
    %13 = arith.subf %12, %11 : vector<8x32xf32>
    %cst_7 = arith.constant dense<0xFF800000> : vector<8xf32>
    %14 = vector.multi_reduction <maximumf>, %2, %cst_7 [1] : vector<8x32xf32> to vector<8xf32>
    %15 = vector.shape_cast %14 : vector<8xf32> to vector<8x1xf32>
    %cst_8 = arith.constant dense<0xFF800000> : vector<8xf32>
    %16 = vector.multi_reduction <maximumf>, %5, %cst_8 [1] : vector<8x32xf32> to vector<8xf32>
    %17 = vector.shape_cast %16 : vector<8xf32> to vector<8x1xf32>
    %18 = vector.broadcast %15 : vector<8x1xf32> to vector<8x32xf32>
    %19 = arith.subf %2, %18 : vector<8x32xf32>
    %20 = vector.broadcast %17 : vector<8x1xf32> to vector<8x32xf32>
    %21 = arith.subf %5, %20 : vector<8x32xf32>
    %22 = math.exp %19 : vector<8x32xf32>
    %23 = math.exp %21 : vector<8x32xf32>
    %cst_9 = arith.constant dense<0.000000e+00> : vector<8xf32>
    %24 = vector.multi_reduction <add>, %22, %cst_9 [1] : vector<8x32xf32> to vector<8xf32>
    %25 = vector.shape_cast %24 : vector<8xf32> to vector<8x1xf32>
    %cst_10 = arith.constant dense<0.000000e+00> : vector<8xf32>
    %26 = vector.multi_reduction <add>, %23, %cst_10 [1] : vector<8x32xf32> to vector<8xf32>
    %27 = vector.shape_cast %26 : vector<8xf32> to vector<8x1xf32>
    %28 = arith.mulf %22, %13 : vector<8x32xf32>
    %29 = arith.mulf %23, %13 : vector<8x32xf32>
    %cst_11 = arith.constant dense<0.000000e+00> : vector<8xf32>
    %30 = vector.multi_reduction <add>, %28, %cst_11 [1] : vector<8x32xf32> to vector<8xf32>
    %31 = vector.shape_cast %30 : vector<8xf32> to vector<8x1xf32>
    %cst_12 = arith.constant dense<0.000000e+00> : vector<8xf32>
    %32 = vector.multi_reduction <add>, %29, %cst_12 [1] : vector<8x32xf32> to vector<8xf32>
    %33 = vector.shape_cast %32 : vector<8xf32> to vector<8x1xf32>
    %34 = arith.mulf %22, %11 : vector<8x32xf32>
    %cst_13 = arith.constant dense<0.000000e+00> : vector<8xf32>
    %35 = vector.multi_reduction <add>, %34, %cst_13 [1] : vector<8x32xf32> to vector<8xf32>
    %36 = vector.shape_cast %35 : vector<8xf32> to vector<8x1xf32>
    %37 = tpu.reciprocal %25 {approx = true} : vector<8x1xf32> -> vector<8x1xf32>
    %38 = arith.mulf %25, %37 : vector<8x1xf32>
    %cst_14 = arith.constant 2.000000e+00 : f32
    %39 = vector.broadcast %cst_14 : f32 to vector<8x1xf32>
    %40 = arith.subf %39, %38 : vector<8x1xf32>
    %41 = arith.mulf %37, %40 : vector<8x1xf32>
    %42 = arith.mulf %36, %41 : vector<8x1xf32>
    %43 = arith.mulf %23, %11 : vector<8x32xf32>
    %cst_15 = arith.constant dense<0.000000e+00> : vector<8xf32>
    %44 = vector.multi_reduction <add>, %43, %cst_15 [1] : vector<8x32xf32> to vector<8xf32>
    %45 = vector.shape_cast %44 : vector<8xf32> to vector<8x1xf32>
    %46 = tpu.reciprocal %27 {approx = true} : vector<8x1xf32> -> vector<8x1xf32>
    %47 = arith.mulf %27, %46 : vector<8x1xf32>
    %cst_16 = arith.constant 2.000000e+00 : f32
    %48 = vector.broadcast %cst_16 : f32 to vector<8x1xf32>
    %49 = arith.subf %48, %47 : vector<8x1xf32>
    %50 = arith.mulf %46, %49 : vector<8x1xf32>
    %51 = arith.mulf %45, %50 : vector<8x1xf32>
    %cst_17 = arith.constant 1.000000e+00 : f32
    %52 = vector.broadcast %cst_17 : f32 to vector<8x1xf32>
    %53 = arith.subf %52, %42 : vector<8x1xf32>
    %cst_18 = arith.constant 0.000000e+00 : f32
    %54 = vector.broadcast %cst_18 : f32 to vector<8x1xf32>
    %55 = arith.maximumf %53, %54 : vector<8x1xf32>
    %cst_19 = arith.constant 1.000000e+00 : f32
    %56 = vector.broadcast %cst_19 : f32 to vector<8x1xf32>
    %57 = arith.subf %56, %51 : vector<8x1xf32>
    %cst_20 = arith.constant 0.000000e+00 : f32
    %58 = vector.broadcast %cst_20 : f32 to vector<8x1xf32>
    %59 = arith.maximumf %57, %58 : vector<8x1xf32>
    %cst_21 = arith.constant 1.000000e-30 : f32
    %60 = vector.broadcast %cst_21 : f32 to vector<8x1xf32>
    %61 = arith.maximumf %51, %60 : vector<8x1xf32>
    %62 = math.log %61 : vector<8x1xf32>
    %63 = math.log %42 : vector<8x1xf32>
    %64 = arith.subf %62, %63 : vector<8x1xf32>
    %65 = arith.mulf %51, %64 : vector<8x1xf32>
    %cst_22 = arith.constant 0.000000e+00 : f32
    %66 = vector.broadcast %cst_22 : f32 to vector<8x1xf32>
    %67 = arith.cmpf ogt, %51, %66 : vector<8x1xf32>
    %cst_23 = arith.constant 0.000000e+00 : f32
    %68 = vector.broadcast %cst_23 : f32 to vector<8x1xf32>
    %69 = arith.select %67, %65, %68 : vector<8x1xi1>, vector<8x1xf32>
    %cst_24 = arith.constant 1.000000e-30 : f32
    %70 = vector.broadcast %cst_24 : f32 to vector<8x1xf32>
    %71 = arith.maximumf %59, %70 : vector<8x1xf32>
    %72 = math.log %71 : vector<8x1xf32>
    %73 = math.log %55 : vector<8x1xf32>
    %74 = arith.subf %72, %73 : vector<8x1xf32>
    %75 = arith.mulf %59, %74 : vector<8x1xf32>
    %cst_25 = arith.constant 0.000000e+00 : f32
    %76 = vector.broadcast %cst_25 : f32 to vector<8x1xf32>
    %77 = arith.cmpf ogt, %59, %76 : vector<8x1xf32>
    %cst_26 = arith.constant 0.000000e+00 : f32
    %78 = vector.broadcast %cst_26 : f32 to vector<8x1xf32>
    %79 = arith.select %77, %75, %78 : vector<8x1xi1>, vector<8x1xf32>
    %80 = arith.addf %69, %79 : vector<8x1xf32>
    %81 = vector.shape_cast %80 : vector<8x1xf32> to vector<1x8x1xf32>
    %cst_27 = arith.constant dense<0.000000e+00> : vector<1xf32>
    %82 = vector.multi_reduction <add>, %81, %cst_27 [1, 2] : vector<1x8x1xf32> to vector<1xf32>
    %83 = vector.shape_cast %82 : vector<1xf32> to vector<1x1x1xf32>
    %84 = vector.extract %83[0, 0, 0] : f32 from vector<1x1x1xf32>
    %85 = tpu.reciprocal %33 {approx = true} : vector<8x1xf32> -> vector<8x1xf32>
    %86 = arith.mulf %33, %85 : vector<8x1xf32>
    %cst_28 = arith.constant 2.000000e+00 : f32
    %87 = vector.broadcast %cst_28 : f32 to vector<8x1xf32>
    %88 = arith.subf %87, %86 : vector<8x1xf32>
    %89 = arith.mulf %85, %88 : vector<8x1xf32>
    %90 = vector.broadcast %89 : vector<8x1xf32> to vector<8x32xf32>
    %91 = arith.mulf %29, %90 : vector<8x32xf32>
    %92 = math.log %33 : vector<8x1xf32>
    %93 = vector.broadcast %92 : vector<8x1xf32> to vector<8x32xf32>
    %94 = arith.subf %21, %93 : vector<8x32xf32>
    %95 = math.log %31 : vector<8x1xf32>
    %96 = vector.broadcast %95 : vector<8x1xf32> to vector<8x32xf32>
    %97 = arith.subf %19, %96 : vector<8x32xf32>
    %98 = arith.subf %94, %97 : vector<8x32xf32>
    %99 = arith.mulf %91, %98 : vector<8x32xf32>
    %100 = vector.shape_cast %99 : vector<8x32xf32> to vector<1x8x32xf32>
    %cst_29 = arith.constant dense<0.000000e+00> : vector<1xf32>
    %101 = vector.multi_reduction <add>, %100, %cst_29 [1, 2] : vector<1x8x32xf32> to vector<1xf32>
    %102 = vector.shape_cast %101 : vector<1xf32> to vector<1x1x1xf32>
    %103 = vector.extract %102[0, 0, 0] : f32 from vector<1x1x1xf32>
    %cst_30 = arith.constant 1.000000e+00 : f32
    %104 = arith.mulf %cst_30, %84 : f32
    %cst_31 = arith.constant 8.000000e+00 : f32
    %105 = arith.mulf %cst_31, %103 : f32
    %106 = arith.addf %104, %105 : f32
    %107 = vector.broadcast %106 : f32 to vector<1x8x128xf32>
    %c0_32 = arith.constant 0 : index
    %c0_33 = arith.constant 0 : index
    %c0_34 = arith.constant 0 : index
    %108 = vector.load %arg4[%c0_32, %c0_33, %c0_34] : memref<1x8x128xf32, #tpu.memory_space<vmem>>, vector<1x8x128xf32>
    tpu.vector_store %arg4[%c0_32, %c0_33, %c0_34], %107 {strides = array<i32>} : memref<1x8x128xf32, #tpu.memory_space<vmem>>, vector<1x8x128xf32>,
    return
  }
  func.func @transform_0(%arg0: i32) -> (i32, i32) {
    %c0_i32 = arith.constant 0 : i32
    %c0_i32_0 = arith.constant 0 : i32
    return %arg0, %c0_i32 : i32, i32
  }
  func.func @transform_1(%arg0: i32) -> (i32, i32) {
    %c0_i32 = arith.constant 0 : i32
    %c0_i32_0 = arith.constant 0 : i32
    return %arg0, %c0_i32 : i32, i32
  }
  func.func @transform_2(%arg0: i32) -> (i32, i32) {
    %c0_i32 = arith.constant 0 : i32
    %c0_i32_0 = arith.constant 0 : i32
    return %arg0, %c0_i32 : i32, i32
  }
  func.func @transform_3(%arg0: i32) -> (i32, i32, i32) {
    %c0_i32 = arith.constant 0 : i32
    %c0_i32_0 = arith.constant 0 : i32
    %c0_i32_1 = arith.constant 0 : i32
    return %arg0, %c0_i32, %c0_i32_0 : i32, i32, i32
  }
}

</mosaic_0001>

<bundles_post_ra>
// kernel: tpu_custom_call.1
= control target key start
LH: loop header
LB: loop body
LE: loop exit
PB: predicated region body
PF: predicated region fallthrough
CT: control target
= control target key end

     0   :  { %vm29_vm0 = vcmask 261120   ;;  %v205_v5 = vmov 0   ;;  %s270_s0 = inlined_call_operand.vmem [shape: s32[8,1], index: 0, kind: input, shape index: {}]   ;;  %s271_s1 = inlined_call_operand.vmem [shape: f32[8,32], index: 1, kind: input, shape index: {}]   ;;  %s272_s2 = inlined_call_operand.vmem [shape: f32[8,32], index: 2, kind: input, shape index: {}]   ;;  %s273_s3 = inlined_call_operand.hbm [shape: f32[1,8,128], index: 3, kind: output, shape index: {}]  }
   0x1   :  { %v17_v0 = vld [vmem:[%s272_s2] sm:$0xff]  ;;  %157 = vset.pattern.permute.xlu1 %v205_v5  ;;  %158 = vset.pattern.permute.xlu0 %v205_v5 }
   0x2   :  { %v15_v1 = vld [vmem:[%s271_s1] sm:$0xff]  ;;  %v18_v3 = vmul.f32 0.25, %v17_v0 }
   0x3   :  { %v19_v2 = vld [vmem:[%s270_s0] sm:$0xff]  ;;  %v16_v4 = vmul.f32 0.25, %v15_v1 }
   0x4   :  { %8 = vsyncpa [#allocation3], 0  ;;  %23 = vperm.xlu1 %157, %v19_v2   ;;  %v33_v6 = vsel %vm29_vm0, %v18_v3, -inf  ;;  %v20_v14 = vlaneseq  ;;  %v206_v20 = vmov 0.0   ;;  %vm97_vm4 = vcmask 7168   ;;  %s207_s18 = smov [#allocation2]  }
   0x5   :  { %34 = vmax.xlane.f32.xlu0 %v33_v6  ;;  %v30_v7 = vsel %vm29_vm0, %v16_v4, -inf  ;;  %s141_s19 = sshll.u32 %s207_s18, 4  ;;  %s142_s19 = int_to_ptr.vmem [resolvable:$true] %s141_s19 }
   0x6   :  { %v21_v15 = vand.u32 127, %v20_v14  ;;  %s181_s21 = scalar_lea.vmem %s142_s19, 128  ;;  %p186_p1 = scmp.lt.s32.totalorder %s142_s19, %s142_s19 }
   0x7   :  { %p182_p0 = scmp.ne.s32.totalorder %s142_s19, %s181_s21  ;;  %p187_p2 = scmp.lt.s32.totalorder %s181_s21, %s181_s21 }
   0x9   :  { %31 = vmax.xlane.f32.xlu0 %v30_v7  ;;  %p188_p3 = por %p187_p2, %p186_p1 }
   0xb   :  { %p189_p4 = pnand %p188_p3, %p182_p0 }
  0x83   :  { %v24_v16 = vpop.permute.xlu1 %23 }
  0x84   :  { %vm25_vm1 = vcmp.eq.s32.totalorder %v21_v15, %v24_v16 }
  0x85   :  { %v149_v21 = vsel %vm25_vm1, 1.0, %v206_v20 }
  0x86   :  { %v28_v24 = vsub.f32 1.0, %v149_v21 }
  0x92   :  { %v35_v8 = vpop.xlane.xlu0 %34 }
  0x93   :  { %v239_v9 = vsub.f32 %v18_v3, %v35_v8 }
  0x95   :  { %v40_v10 = vmul.f32 1.442695, %v239_v9 }
  0x96   :  { %v32_v11 = vpop.xlane.xlu0 %31 }
  0x97   :  { %159 = vpow2.f32 %v40_v10  ;;  %v242_v12 = vsub.f32 %v16_v4, %v32_v11 }
  0x99   :  { %v38_v13 = vmul.f32 1.442695, %v242_v12 }
  0x9b   :  { %161 = vpow2.f32 %v38_v13 }
  0xa1   :  { %v160_v17 = vpop.eup %159 }
  0xa2   :  { %v45_v18 = vsel %vm29_vm0, %v160_v17, 0.0  ;;  %v65_v23 = vmul.f32 %v160_v17, %v149_v21  ;;  %v249_v28 = vmul.f32 %v160_v17, %v28_v24 }
  0xa3   :  { %46 = vadd.xlane.f32.xlu1 %v45_v18 }
  0xa4   :  { %v66_v25 = vsel %vm29_vm0, %v65_v23, 0.0  ;;  %v53_v29 = vsel %vm29_vm0, %v249_v28, 0.0 }
  0xa5   :  { %v162_v19 = vpop.eup %161 }
  0xa6   :  { %v42_v22 = vsel %vm29_vm0, %v162_v19, 0.0  ;;  %v56_v26 = vmul.f32 %v162_v19, %v149_v21  ;;  %v48_v30 = vmul.f32 %v162_v19, %v28_v24 }
  0xa7   :  { %43 = vadd.xlane.f32.xlu0 %v42_v22 }
  0xa8   :  { %v57_v27 = vsel %vm29_vm0, %v56_v26, 0.0  ;;  %v50_v31 = vsel %vm29_vm0, %v48_v30, 0.0 }
  0xab   :  { %67 = vadd.xlane.f32.xlu0 %v66_v25 }
  0xaf   :  { %58 = vadd.xlane.f32.xlu0 %v57_v27 }
  0xb3   :  { %54 = vadd.xlane.f32.xlu0 %v53_v29 }
  0xb7   :  { %51 = vadd.xlane.f32.xlu0 %v50_v31 }
 0x130   :  { %v47_v32 = vpop.xlane.xlu1 %46 }
 0x131   :  { %163 = vrcp.f32 %v47_v32 }
 0x134   :  { %v44_v33 = vpop.xlane.xlu0 %43 }
 0x135   :  { %165 = vrcp.f32 %v44_v33 }
 0x138   :  { %v68_v34 = vpop.xlane.xlu0 %67 }
 0x13b   :  { %v164_v35 = vpop.eup %163 }
 0x13c   :  { %v70_v36 = vmul.f32 %v164_v35, %v47_v32  ;;  %v59_v37 = vpop.xlane.xlu0 %58 }
 0x13e   :  { %v71_v38 = vsub.f32 2.0, %v70_v36 }
 0x13f   :  { %v166_v39 = vpop.eup %165 }
 0x140   :  { %v61_v40 = vmul.f32 %v166_v39, %v44_v33  ;;  %v72_v41 = vmul.f32 %v164_v35, %v71_v38  ;;  %v55_v42 = vpop.xlane.xlu0 %54 }
 0x141   :  { %167 = vrcp.f32 %v55_v42 }
 0x142   :  { %v62_v43 = vsub.f32 2.0, %v61_v40  ;;  %v73_v44 = vmul.f32 %v72_v41, %v68_v34 }
 0x144   :  { %v76_v45 = vsub.f32 1.0, %v73_v44  ;;  %v78_v46 = vmax.f32 %v73_v44, 1e-30  ;;  %v63_v47 = vmul.f32 %v166_v39, %v62_v43  ;;  %v52_v48 = vpop.xlane.xlu0 %51  ;;  %vm85_vm2 = vcmp.gt.f32.partialorder %v73_v44, 0.0 }
 0x146   :  { %169 = vlog2.f32 %v78_v46  ;;  %v64_v49 = vmul.f32 %v63_v47, %v59_v37  ;;  %v77_v50 = vmax.f32 %v76_v45, 0.0 }
 0x147   :  { %171 = vlog2.f32 %v52_v48 }
 0x148   :  { %v74_v51 = vsub.f32 1.0, %v64_v49  ;;  %173 = vlog2.f32 %v64_v49  ;;  %v87_v52 = vmax.f32 %v77_v50, 1e-30  ;;  %vm94_vm3 = vcmp.gt.f32.partialorder %v77_v50, 0.0 }
 0x149   :  { %175 = vlog2.f32 %v55_v42 }
 0x14a   :  { %v75_v53 = vmax.f32 %v74_v51, 0.0  ;;  %177 = vlog2.f32 %v87_v52 }
 0x14b   :  { %v168_v54 = vpop.eup %167 }
 0x14c   :  { %179 = vlog2.f32 %v75_v53  ;;  %v109_v58 = vmul.f32 %v168_v54, %v55_v42 }
 0x14e   :  { %v110_v2 = vsub.f32 2.0, %v109_v58 }
 0x150   :  { %v170_v55 = vpop.eup %169  ;;  %v111_v10 = vmul.f32 %v168_v54, %v110_v2 }
 0x151   :  { %v172_v56 = vpop.eup %171  ;;  %v80_v60 = vmul.f32 0.6931472, %v170_v55 }
 0x152   :  { %v174_v57 = vpop.eup %173  ;;  %v117_v63 = vmul.f32 0.6931472, %v172_v56  ;;  %v112_v18 = vmul.f32 %v111_v10, %v249_v28 }
 0x153   :  { %v176_v59 = vpop.eup %175  ;;  %v82_v61 = vmul.f32 0.6931472, %v174_v57 }
 0x154   :  { %v178_v62 = vpop.eup %177  ;;  %v114_v3 = vmul.f32 0.6931472, %v176_v59  ;;  %v118_v6 = vsub.f32 %v242_v12, %v117_v63 }
 0x155   :  { %v83_v0 = vsub.f32 %v80_v60, %v82_v61  ;;  %v89_v5 = vmul.f32 0.6931472, %v178_v62 }
 0x156   :  { %v180_v1 = vpop.eup %179  ;;  %v115_v11 = vsub.f32 %v239_v9, %v114_v3 }
 0x157   :  { %v91_v4 = vmul.f32 0.6931472, %v180_v1  ;;  %v84_v7 = vmul.f32 %v83_v0, %v73_v44 }
 0x158   :  { %v119_v14 = vsub.f32 %v115_v11, %v118_v6 }
 0x159   :  { %v92_v8 = vsub.f32 %v89_v5, %v91_v4  ;;  %v86_v15 = vsel %vm85_vm2, %v84_v7, 0.0 }
 0x15a   :  { %v120_v20 = vmul.f32 %v119_v14, %v112_v18 }
 0x15b   :  { %v93_v13 = vmul.f32 %v92_v8, %v77_v50 }
 0x15c   :  { %v121_v12 = vsel %vm29_vm0, %v120_v20, 0.0 }
 0x15d   :  { %v95_v16 = vsel %vm94_vm3, %v93_v13, 0.0 }
 0x15e   :  { %v96_v17 = vadd.f32 %v95_v16, %v86_v15 }
 0x160   :  { %v98_v19 = vsel %vm97_vm4, %v96_v17, 0.0 }
 0x161   :  { %99 = vadd.xlane.f32.xlu0 %v98_v19 }
 0x165   :  { %122 = vadd.xlane.f32.xlu0 %v121_v12 }
 0x1ee   :  { %v100_v21 = vpop.xlane.xlu0 %99 }
 0x1ef   :  { %v101_v22 = vrot.slane %v100_v21, 4 }
 0x1f1   :  { %v102_v23 = vadd.f32 %v101_v22, %v100_v21 }
 0x1f2   :  { %v123_v9 = vpop.xlane.xlu0 %122 }
 0x1f3   :  { %v103_v24 = vrot.slane %v102_v23, 2  ;;  %v124_v25 = vrot.slane %v123_v9, 4 }
 0x1f5   :  { %v125_v26 = vadd.f32 %v124_v25, %v123_v9  ;;  %v104_v27 = vadd.f32 %v103_v24, %v102_v23 }
 0x1f7   :  { %v126_v29 = vrot.slane %v125_v26, 2  ;;  %v105_v30 = vrot.slane %v104_v27, 1 }
 0x1f9   :  { %v127_v31 = vadd.f32 %v126_v29, %v125_v26  ;;  %v106_v32 = vadd.f32 %v105_v30, %v104_v27 }
 0x1fb   :  { %150 = vpush %v106_v32  ;;  %v128_v28 = vrot.slane %v127_v31, 1 }
 0x1fd   :  { %v129_v33 = vadd.f32 %v128_v28, %v127_v31 }
 0x1ff   :  { %152 = vpush %v129_v33 }
 0x22c   :  { %s151_s0 = spop %150 }
 0x230   :  { %s153_s1 = spop %152 }
 0x231   :  { %s131_s2 = smul.f32 8.0, %s153_s1 }
 0x233   :  { %s132_s20 = sadd.f32 %s151_s0, %s131_s2 }
 0x235   :  { %v133_v34 = vstv %s132_s20 }
 0x236   :  { %134 = vst [vmem:[#allocation2] sm:$0xff] %v133_v34 }
 0x237   :  { %192 = shalt.err (!%p189_p4)
}
 0x238   :  { %s193_s24 = scalar_lea.hbm %s273_s3, 128 }
 0x239   :  { %p194_p5 = scmp.ne.s32.totalorder %s273_s3, %s193_s24  ;;  %p197_p6 = scmp.lt.u32.totalorder %s193_s24, %s273_s3 }
 0x23b   :  { %p199_p7 = pnand %p197_p6, %p194_p5 }
 0x23d   :  { %202 = shalt.err (!%p199_p7)
}
 0x23e   :  { %144 = dma.vmem_to_hbm [thread:$0]  %s142_s19, 128, %s273_s3, [#allocation3]  }
 0x23f   :  { %203 = dma.done.wait [#allocation3], 128  }
 0x240   :  { %204 = vsyncadd [#allocation3], 4294967168 }
 0x241   :  { %148 = vsyncpa [#allocation3], 1 }

</bundles_post_ra>
